<compile_context>
chip_gen: v5e
topology: v5e:2x2
jax: 0.10.0
libtpu: 0.0.40
codegen_flags: <defaults>
</compile_context>

<pallas_src>
import functools

import jax
import jax.numpy as jnp
from jax.experimental import pallas as pl
from jax.experimental.pallas import tpu as pltpu


# ----------------------------------------------------------------------------
# Pallas kernel: fused concat + (x + pos_emb) -> LayerNorm(d_model) affine
# ----------------------------------------------------------------------------
def _dpct_embed_ln_kernel(txt_ref, tail_ref, pos_ref, gamma_ref, beta_ref,
                          o_ref, xcat_ref, *, eps, s_txt):
    # txt_ref:   (TB, S_txt, D)   encoded text tokens
    # tail_ref:  (TB, S-S_txt, D) [clip_txt, t_emb, clip_img, final_emb]
    # pos_ref:   (S, D)   f32 positional table (constant index_map -> resident)
    # gamma_ref: (1, D)   f32 LayerNorm weight
    # beta_ref:  (1, D)   f32 LayerNorm bias
    # o_ref:     (TB, S, D) output block
    # xcat_ref:  (TB, S, D) f32 VMEM scratch used to stage the fused concat
    #
    # Stage the sequence "concat" into an aligned full-size f32 scratch tile.
    # Any sublane-masked stores at the s_txt boundary hit plain VMEM scratch,
    # while the pipelined output buffer below receives exactly one full-tile,
    # lane-dense, unmasked store.
    xcat_ref[:, :s_txt, :] = txt_ref[...].astype(jnp.float32)
    xcat_ref[:, s_txt:, :] = tail_ref[...].astype(jnp.float32)

    y = xcat_ref[...] + pos_ref[...][None, :, :]             # (TB, S, D) f32
    d = y.shape[-1]
    inv_d = jnp.float32(1.0 / d)

    # Two-pass mean/variance over d_model (matches reference LayerNorm
    # numerics; more robust than E[x^2] - E[x]^2).
    # NOTE(v7x): these lane reductions could be offloaded to the otherwise-idle
    # MXU (dot with a (D,1) ones column) to relieve XLU pressure once HBM hits
    # 3.2 TB/s; jnp.sum is kept here for robust lowering — on v5e/v6e the
    # kernel is DMA-bound and the reductions hide under the HBM pipeline.
    mean = jnp.sum(y, axis=-1, keepdims=True) * inv_d         # (TB, S, 1)
    c = y - mean
    var = jnp.sum(c * c, axis=-1, keepdims=True) * inv_d      # (TB, S, 1)
    xhat = c * jax.lax.rsqrt(var + jnp.float32(eps))

    gamma = gamma_ref[...].reshape(1, 1, d)
    beta = beta_ref[...].reshape(1, 1, d)
    o_ref[...] = (xhat * gamma + beta).astype(o_ref.dtype)


def _pick_tb(batch, seq, d_model, itemsize, target_block_bytes=4 << 20):
    """Batch rows per grid step.

    Targets ~2-4 MiB output blocks (amortizes the ~0.35 us/step pipeline
    overhead; ~85%+ of HBM roofline), capped so that (a) the grid has at least
    2 steps when B >= 2 (both v7x TensorCores get work via the "parallel"
    grid axis) and (b) the double-buffered per-step VMEM footprint stays
    comfortably under the 32 MiB scoped limit on every generation.
    """
    row_bytes = max(1, seq * d_model * itemsize)
    tb = max(1, min(batch, target_block_bytes // row_bytes))
    if batch >= 2:
        tb = min(tb, (batch + 1) // 2)   # grid >= 2 steps -> megacore sharding
    return max(1, tb)


def fused_embed_layernorm(encoded_txt, tail, pos_table, gamma, beta, *, eps=1e-5):
    """encoded_txt: (B, S_txt, D), tail: (B, S-S_txt, D), pos_table: (S, D),
    gamma/beta: (D,) -> (B, S, D)."""
    B, S_txt, D = encoded_txt.shape
    S = pos_table.shape[0]
    n_tail = S - S_txt
    assert tail.shape == (B, n_tail, D)
    out_dtype = encoded_txt.dtype

    # Constants pre-cast to f32 once here (no per-grid-step VPU casts in-kernel);
    # their index_maps are constant so Pallas keeps them resident in VMEM.
    pos_f32 = pos_table.astype(jnp.float32)
    gamma2 = gamma.astype(jnp.float32).reshape(1, D)
    beta2 = beta.astype(jnp.float32).reshape(1, D)

    TB = _pick_tb(B, S, D, out_dtype.itemsize)
    grid = (pl.cdiv(B, TB),)   # partial last block OK: OOB writes are dropped

    kernel = functools.partial(_dpct_embed_ln_kernel, eps=eps, s_txt=S_txt)
    return pl.pallas_call(
        kernel,
        out_shape=jax.ShapeDtypeStruct((B, S, D), out_dtype),
        grid=grid,
        in_specs=[
            pl.BlockSpec((TB, S_txt, D), lambda b: (b, 0, 0)),
            pl.BlockSpec((TB, n_tail, D), lambda b: (b, 0, 0)),
            pl.BlockSpec((S, D), lambda b: (0, 0)),    # constant -> resident
            pl.BlockSpec((1, D), lambda b: (0, 0)),
            pl.BlockSpec((1, D), lambda b: (0, 0)),
        ],
        out_specs=pl.BlockSpec((TB, S, D), lambda b: (b, 0, 0)),
        scratch_shapes=[pltpu.VMEM((TB, S, D), jnp.float32)],
        compiler_params=pltpu.CompilerParams(
            dimension_semantics=("parallel",),
            vmem_limit_bytes=32 * 1024 * 1024,
        ),
    )(encoded_txt, tail, pos_f32, gamma2, beta2)


# ----------------------------------------------------------------------------
# Module-equivalent wrapper
# ----------------------------------------------------------------------------
def get_time_embedding(t, d_model):
    """Matches DPCT_Embeddings.get_time_embedding: t (B,) -> (B, d_model)."""
    t = t.astype(jnp.float32)[:, None]                                 # (B, 1)
    inv_freq = 1.0 / (10000.0 ** (jnp.arange(0, d_model, 2, dtype=jnp.float32)
                                  / d_model))                          # (D/2,)
    arg = t * inv_freq[None, :]                                        # (B, D/2)
    return jnp.concatenate([jnp.sin(arg), jnp.cos(arg)], axis=-1)      # (B, D)


def init_params(key, max_seq_len_dpct, d_model):
    k_pos, = jax.random.split(key, 1)
    return {
        # nn.Parameter(torch.ones(d_model))
        "final_emb": jnp.ones((d_model,), jnp.float32),
        # nn.Embedding(max_seq_len_dpct, d_model) — N(0,1) init
        "pos_emb": jax.random.normal(k_pos, (max_seq_len_dpct, d_model),
                                     jnp.float32),
        # nn.LayerNorm(d_model)
        "ln_gamma": jnp.ones((d_model,), jnp.float32),
        "ln_beta": jnp.zeros((d_model,), jnp.float32),
    }


def dpct_embeddings_forward(params, clip_img_emb, t, encoded_txt, clip_txt_emb,
                            *, max_seq_len_dpct, d_model):
    """Forward pass of DPCT_Embeddings (inference: dropout = identity)."""
    B, S_txt, D = encoded_txt.shape
    assert S_txt + 4 == max_seq_len_dpct, \
        "encoded_txt seq length + 4 must equal max_seq_len_dpct"

    t_emb = get_time_embedding(t, d_model).astype(encoded_txt.dtype)    # (B, D)
    final_emb = jnp.broadcast_to(params["final_emb"][None, :],
                                 (B, d_model)).astype(encoded_txt.dtype)

    # Tiny packed tail (B, 4, D); the big (B, S, D) concat is fused into the
    # kernel instead of materialized in HBM.  (Folding the sin/cos + broadcast
    # into the kernel itself would only help small-batch launch latency.)
    tail = jnp.stack(
        [clip_txt_emb.astype(encoded_txt.dtype), t_emb,
         clip_img_emb.astype(encoded_txt.dtype), final_emb], axis=1)     # (B, 4, D)

    # positions = arange(max_seq_len) for every batch element, so the gathered
    # pos_emb is the full embedding table broadcast across batch.
    pos_table = params["pos_emb"]                                        # (S, D)

    return fused_embed_layernorm(encoded_txt, tail, pos_table,
                                 params["ln_gamma"], params["ln_beta"])


# Pure-JAX reference for correctness checking (mirrors the torch module).
def _reference(params, clip_img_emb, t, encoded_txt, clip_txt_emb,
               *, max_seq_len_dpct, d_model):
    B = encoded_txt.shape[0]
    t_emb = get_time_embedding(t, d_model)
    final_emb = jnp.broadcast_to(params["final_emb"][None, :], (B, d_model))
    x = jnp.concatenate(
        [encoded_txt, clip_txt_emb[:, None, :], t_emb[:, None, :],
         clip_img_emb[:, None, :], final_emb[:, None, :]], axis=1)
    x = x + params["pos_emb"][None, :, :]
    mean = jnp.mean(x, axis=-1, keepdims=True)
    var = jnp.mean(jnp.square(x - mean), axis=-1, keepdims=True)
    xhat = (x - mean) / jnp.sqrt(var + 1e-5)
    return xhat * params["ln_gamma"] + params["ln_beta"]


if __name__ == "__main__":
    B = 2
    D_MODEL = 128          # lane-dense feature dim (multiple of 128)
    SEQ_TXT = 4
    MAX_SEQ = SEQ_TXT + 4  # encoded_txt + clip_txt + t + clip_img + final

    key = jax.random.PRNGKey(0)
    k_params, k_img, k_txt, k_enc, k_t = jax.random.split(key, 5)

    params = init_params(k_params, MAX_SEQ, D_MODEL)

    clip_img_emb = jax.random.normal(k_img, (B, D_MODEL), jnp.float32)
    clip_txt_emb = jax.random.normal(k_txt, (B, D_MODEL), jnp.float32)
    encoded_txt = jax.random.normal(k_enc, (B, SEQ_TXT, D_MODEL), jnp.float32)
    t = jax.random.randint(k_t, (B,), 0, 1000).astype(jnp.int32)

    out = dpct_embeddings_forward(params, clip_img_emb, t, encoded_txt,
                                  clip_txt_emb,
                                  max_seq_len_dpct=MAX_SEQ, d_model=D_MODEL)
    out = jax.block_until_ready(out)

    ref = _reference(params, clip_img_emb, t, encoded_txt, clip_txt_emb,
                     max_seq_len_dpct=MAX_SEQ, d_model=D_MODEL)
    assert out.shape == (B, MAX_SEQ, D_MODEL)
    assert jnp.allclose(out, ref, atol=1e-4, rtol=1e-4), "mismatch vs reference"

    print("KERNEL_OK")
</pallas_src>

<mosaic_0001>
module attributes {stable_mosaic.version = 11 : i64} {
  func.func @_dpct_embed_ln_kernel(%arg0: i32, %arg1: memref<1x4x128xf32, #tpu.memory_space<vmem>>, %arg2: memref<1x4x128xf32, #tpu.memory_space<vmem>>, %arg3: memref<8x128xf32, #tpu.memory_space<vmem>>, %arg4: memref<1x128xf32, #tpu.memory_space<vmem>>, %arg5: memref<1x128xf32, #tpu.memory_space<vmem>>, %arg6: memref<1x8x128xf32, #tpu.memory_space<vmem>>, %arg7: memref<1x8x128xf32, #tpu.memory_space<vmem>>) attributes {dimension_semantics = [#tpu.dimension_semantics<parallel>], iteration_bounds = array<i64: 2>, scalar_prefetch = 0 : i64, scratch_operands = 1 : i64, tpu.core_type = #tpu.core_type<tc>, window_params = [{transform_indices = @transform_0, window_bounds = array<i64: 1, 4, 128>}, {transform_indices = @transform_1, window_bounds = array<i64: 1, 4, 128>}, {pipeline_mode = #tpu.pipeline_mode<synchronous>, transform_indices = @transform_2, window_bounds = array<i64: 8, 128>}, {pipeline_mode = #tpu.pipeline_mode<synchronous>, transform_indices = @transform_3, window_bounds = array<i64: 1, 128>}, {pipeline_mode = #tpu.pipeline_mode<synchronous>, transform_indices = @transform_4, window_bounds = array<i64: 1, 128>}, {transform_indices = @transform_5, window_bounds = array<i64: 1, 8, 128>}]} {
    %c0 = arith.constant 0 : index
    %c0_0 = arith.constant 0 : index
    %c0_1 = arith.constant 0 : index
    %0 = vector.load %arg1[%c0, %c0_0, %c0_1] : memref<1x4x128xf32, #tpu.memory_space<vmem>>, vector<1x4x128xf32>
    %c0_2 = arith.constant 0 : index
    %c0_3 = arith.constant 0 : index
    %c0_4 = arith.constant 0 : index
    %1 = vector.load %arg7[%c0_2, %c0_3, %c0_4] : memref<1x8x128xf32, #tpu.memory_space<vmem>>, vector<1x4x128xf32>
    tpu.vector_store %arg7[%c0_2, %c0_3, %c0_4], %0 {strides = array<i32>} : memref<1x8x128xf32, #tpu.memory_space<vmem>>, vector<1x4x128xf32>,
    %c0_5 = arith.constant 0 : index
    %c0_6 = arith.constant 0 : index
    %c0_7 = arith.constant 0 : index
    %2 = vector.load %arg2[%c0_5, %c0_6, %c0_7] : memref<1x4x128xf32, #tpu.memory_space<vmem>>, vector<1x4x128xf32>
    %c0_8 = arith.constant 0 : index
    %c4 = arith.constant 4 : index
    %c0_9 = arith.constant 0 : index
    %3 = vector.load %arg7[%c0_8, %c4, %c0_9] : memref<1x8x128xf32, #tpu.memory_space<vmem>>, vector<1x4x128xf32>
    tpu.vector_store %arg7[%c0_8, %c4, %c0_9], %2 {strides = array<i32>} : memref<1x8x128xf32, #tpu.memory_space<vmem>>, vector<1x4x128xf32>,
    %c0_10 = arith.constant 0 : index
    %c0_11 = arith.constant 0 : index
    %c0_12 = arith.constant 0 : index
    %4 = vector.load %arg7[%c0_10, %c0_11, %c0_12] : memref<1x8x128xf32, #tpu.memory_space<vmem>>, vector<1x8x128xf32>
    %c0_13 = arith.constant 0 : index
    %c0_14 = arith.constant 0 : index
    %5 = vector.load %arg3[%c0_13, %c0_14] : memref<8x128xf32, #tpu.memory_space<vmem>>, vector<8x128xf32>
    %6 = vector.shape_cast %5 : vector<8x128xf32> to vector<1x8x128xf32>
    %7 = arith.addf %4, %6 : vector<1x8x128xf32>
    %cst = arith.constant dense<0.000000e+00> : vector<1x8xf32>
    %8 = vector.multi_reduction <add>, %7, %cst [2] : vector<1x8x128xf32> to vector<1x8xf32>
    %9 = vector.shape_cast %8 : vector<1x8xf32> to vector<1x8x1xf32>
    %cst_15 = arith.constant 7.812500e-03 : f32
    %10 = vector.broadcast %cst_15 : f32 to vector<1x8x1xf32>
    %11 = arith.mulf %9, %10 : vector<1x8x1xf32>
    %12 = vector.broadcast %11 : vector<1x8x1xf32> to vector<1x8x128xf32>
    %13 = arith.subf %7, %12 : vector<1x8x128xf32>
    %14 = arith.mulf %13, %13 : vector<1x8x128xf32>
    %cst_16 = arith.constant dense<0.000000e+00> : vector<1x8xf32>
    %15 = vector.multi_reduction <add>, %14, %cst_16 [2] : vector<1x8x128xf32> to vector<1x8xf32>
    %16 = vector.shape_cast %15 : vector<1x8xf32> to vector<1x8x1xf32>
    %cst_17 = arith.constant 7.812500e-03 : f32
    %17 = vector.broadcast %cst_17 : f32 to vector<1x8x1xf32>
    %18 = arith.mulf %16, %17 : vector<1x8x1xf32>
    %cst_18 = arith.constant 9.99999974E-6 : f32
    %19 = vector.broadcast %cst_18 : f32 to vector<1x8x1xf32>
    %20 = arith.addf %18, %19 : vector<1x8x1xf32>
    %21 = math.rsqrt %20 : vector<1x8x1xf32>
    %22 = vector.broadcast %21 : vector<1x8x1xf32> to vector<1x8x128xf32>
    %23 = arith.mulf %13, %22 : vector<1x8x128xf32>
    %c0_19 = arith.constant 0 : index
    %c0_20 = arith.constant 0 : index
    %24 = vector.load %arg4[%c0_19, %c0_20] : memref<1x128xf32, #tpu.memory_space<vmem>>, vector<1x128xf32>
    %25 = vector.shape_cast %24 : vector<1x128xf32> to vector<1x1x128xf32>
    %c0_21 = arith.constant 0 : index
    %c0_22 = arith.constant 0 : index
    %26 = vector.load %arg5[%c0_21, %c0_22] : memref<1x128xf32, #tpu.memory_space<vmem>>, vector<1x128xf32>
    %27 = vector.shape_cast %26 : vector<1x128xf32> to vector<1x1x128xf32>
    %28 = vector.broadcast %25 : vector<1x1x128xf32> to vector<1x8x128xf32>
    %29 = arith.mulf %23, %28 : vector<1x8x128xf32>
    %30 = vector.broadcast %27 : vector<1x1x128xf32> to vector<1x8x128xf32>
    %31 = arith.addf %29, %30 : vector<1x8x128xf32>
    %c0_23 = arith.constant 0 : index
    %c0_24 = arith.constant 0 : index
    %c0_25 = arith.constant 0 : index
    %32 = vector.load %arg6[%c0_23, %c0_24, %c0_25] : memref<1x8x128xf32, #tpu.memory_space<vmem>>, vector<1x8x128xf32>
    tpu.vector_store %arg6[%c0_23, %c0_24, %c0_25], %31 {strides = array<i32>} : memref<1x8x128xf32, #tpu.memory_space<vmem>>, vector<1x8x128xf32>,
    return
  }
  func.func @transform_0(%arg0: i32) -> (i32, i32, i32) {
    %c0_i32 = arith.constant 0 : i32
    %c0_i32_0 = arith.constant 0 : i32
    %c0_i32_1 = arith.constant 0 : i32
    return %arg0, %c0_i32, %c0_i32_0 : i32, i32, i32
  }
  func.func @transform_1(%arg0: i32) -> (i32, i32, i32) {
    %c0_i32 = arith.constant 0 : i32
    %c0_i32_0 = arith.constant 0 : i32
    %c0_i32_1 = arith.constant 0 : i32
    return %arg0, %c0_i32, %c0_i32_0 : i32, i32, i32
  }
  func.func @transform_2(%arg0: i32) -> (i32, i32) {
    %c0_i32 = arith.constant 0 : i32
    %c0_i32_0 = arith.constant 0 : i32
    %c0_i32_1 = arith.constant 0 : i32
    return %c0_i32, %c0_i32_0 : i32, i32
  }
  func.func @transform_3(%arg0: i32) -> (i32, i32) {
    %c0_i32 = arith.constant 0 : i32
    %c0_i32_0 = arith.constant 0 : i32
    %c0_i32_1 = arith.constant 0 : i32
    return %c0_i32, %c0_i32_0 : i32, i32
  }
  func.func @transform_4(%arg0: i32) -> (i32, i32) {
    %c0_i32 = arith.constant 0 : i32
    %c0_i32_0 = arith.constant 0 : i32
    %c0_i32_1 = arith.constant 0 : i32
    return %c0_i32, %c0_i32_0 : i32, i32
  }
  func.func @transform_5(%arg0: i32) -> (i32, i32, i32) {
    %c0_i32 = arith.constant 0 : i32
    %c0_i32_0 = arith.constant 0 : i32
    %c0_i32_1 = arith.constant 0 : i32
    return %arg0, %c0_i32, %c0_i32_0 : i32, i32, i32
  }
}

</mosaic_0001>

<bundles_post_ra>
// kernel: tpu_custom_call.1
= control target key start
LH: loop header
LB: loop body
LE: loop exit
PB: predicated region body
PF: predicated region fallthrough
CT: control target
= control target key end

     0   :  { %s901_s0 = inlined_call_operand.hbm [shape: f32[2,4,128], index: 0, kind: input, shape index: {}]   ;;  %s902_s1 = inlined_call_operand.hbm [shape: f32[2,4,128], index: 1, kind: input, shape index: {}]   ;;  %s903_s2 = inlined_call_operand.hbm [shape: f32[8,128], index: 2, kind: input, shape index: {}]   ;;  %s904_s3 = inlined_call_operand.vmem [shape: f32[1,128], index: 3, kind: input, shape index: {}]   ;;  %s905_s4 = inlined_call_operand.vmem [shape: f32[1,128], index: 4, kind: input, shape index: {}]   ;;  %s906_s5 = inlined_call_operand.hbm [shape: f32[2,8,128], index: 5, kind: output, shape index: {}]  }
   0x1   :  { %910 = sst [smem:[#allocation17_spill]] %s903_s2 }
   0x2   :  { %10 = vsyncpa [#allocation4], 0 }
   0x3   :  { %12 = vsyncpa [#allocation4 + $0x1], 0 }
   0x4   :  { %13 = vsyncpa [#allocation7], 0 }
   0x5   :  { %15 = vsyncpa [#allocation7 + $0x1], 0 }
   0x6   :  { %16 = vsyncpa [#allocation5], 0 }
   0x7   :  { %18 = vsyncpa [#allocation5 + $0x1], 0  ;;  %s731_s18 = smov 0   ;;  %s733_s19 = smov 0  }
   0x8   :  { %s735_s20 = smov 0   ;;  %s737_s21 = smov 0  }
   0x9 LB: > { %911 = sst [smem:[#allocation14_spill]] %s694_s20  ;;  %s752_s22 = sadd.s32 4294967295, %s698_s21   ;;  %s698_s21 = sphi %s737_s21, %s921_s21   ;;  %s694_s20 = sphi %s735_s20, %s923_s20   ;;  %s690_s19 = sphi %s733_s19, %s925_s19   ;;  %s686_s18 = sphi %s731_s18, %s924_s18  }
   0xa   : > { %s451_s23 = sadd.s32 4294967294, %s698_s21   ;;  %p44_p0 = scmp.ne.s32.totalorder %s690_s19, %s686_s18 }
   0xb   : > { %p45_p1 = scmp.eq.s32.totalorder %s752_s22, 0  ;;  %p157_p2 = scmp.eq.s32.totalorder %s752_s22, 1 }
   0xc   : > { %p163_p3 = scmp.eq.s32.totalorder %s451_s23, 1  ;;  %p452_p5 = scmp.ge.s32.totalorder %s698_s21, 1 }
   0xd   : > { %p761_p4 = por %p45_p1, %p44_p0  ;;  %p170_p7 = scmp.lt.s32.totalorder %s698_s21, 3 }
   0xe   : > { %p766_p6 = por %p163_p3, %p44_p0  ;;  %s914_s2 = sld [smem:[#allocation17_spill]] }
   0xf   : > { %p774_p8 = pnand %p452_p5, %p170_p7  ;;  %s700_s30 = smov [#allocation8]  }
  0x10   : > { %s184_s6 = sshll.u32 %s700_s30, 4  ;;  %s784_s7 = sadd.s32 1, %s698_s21   ;;  %s185_s6 = int_to_ptr.vmem [resolvable:$true] %s184_s6 }
  0x11   : > { %p478_p10 = pneg %p774_p8  ;;  %916 = sst [smem:[#allocation15_spill]] %s784_s7 }
  0x12   : > { %s31_s8 = sadd.s32 1, %s694_s20  ;;  %s28_s9 = ssub.s32 %s698_s21, %s784_s7 }
  0x13   : > { %p479_p11 = pnand %p478_p10, %p45_p1  ;;  %p29_p12 = scmp.eq.s32.totalorder %s28_s9, 0 }
  0x14   : > { %s182_s28 = sshll.u32 %s914_s2, 4  ;;  %p38_p13 = scmp.ne.s32.totalorder %s694_s20, %s690_s19  ;;  %s183_s28 = int_to_ptr.hbm [resolvable:$true] %s182_s28 }
  0x15   : > { %481 = dma.hbm_to_vmem [thread:$0]  (!%p479_p11), %s183_s28, 128, %s185_s6, [#allocation7]  }
  0x16   : > { %p39_p0 = scmp.eq.s32.totalorder %s698_s21, 0  ;;  %p494_p3 = scmp.lt.s32.totalorder %s698_s21, 2 }
  0x17   : > { %s794_s10 = scalar_select %p29_p12, %s694_s20, %s31_s8  }
  0x18   : > { %p40_p5 = por %p39_p0, %p38_p13  ;;  %p798_p7 = por %p157_p2, %p38_p13 }
  0x19   : > { %917 = sst [smem:[#allocation16_spill]] %s794_s10  ;;  %s201_s12 = sand.u32 1, %s694_s20  }
  0x1a   : > { %s456_s13 = sshll.u32 %s698_s21, 2  ;;  %s455_s14 = sshll.u32 %s201_s12, 2 }
  0x1b   : > { %s209_s17 = scalar_lea.hbm %s901_s0, %s456_s13  ;;  %s205_s26 = scalar_lea.vmem [#allocation3], %s455_s14 }
  0x1c   : > { %s211_s23 = sshll.u32 %s209_s17, 4  ;;  %s213_s27 = sshll.u32 %s205_s26, 4  ;;  %s212_s23 = int_to_ptr.hbm [resolvable:$true] %s211_s23  ;;  %s214_s27 = int_to_ptr.vmem [resolvable:$true] %s213_s27 }
  0x1d   : > { %p809_p10 = pnand %p494_p3, %p40_p5  ;;  %s228_s8 = scalar_lea.hbm %s902_s1, %s456_s13 }
  0x1e   : > { %s220_s9 = sand.u32 1, %s698_s21   ;;  %s202_s2 = scalar_lea.sflag [#allocation4], %s201_s12 }
  0x1f   : > { %s564_s15 = sshra.s32 %s212_s23, 4  ;;  %p568_p11 = pneg %p809_p10  ;;  %s565_s15 = int_to_ptr.hbm [resolvable:$true] %s564_s15 }
  0x20   : > { %s566_s16 = scalar_lea.hbm %s565_s15, 4  ;;  %s571_s10 = scalar_lea.hbm %s901_s0, 8 }
  0x21   : > { %p567_p2 = scmp.ne.s32.totalorder %s565_s15, %s566_s16  ;;  %p572_p0 = scmp.lt.s32.totalorder %s565_s15, %s901_s0 }
  0x22   : > { %p573_p3 = scmp.lt.s32.totalorder %s571_s10, %s566_s16 }
  0x23   : > { %p569_p12 = pnand %p568_p11, %p567_p2 }
  0x24   : > { %p574_p5 = por %p573_p3, %p572_p0 }
  0x25   : > { %p570_p13 = pneg %p569_p12 }
  0x27   : > { %p575_p9 = pnand %p574_p5, %p570_p13 }
  0x29   : > { %578 = shalt.err (!%p575_p9)
}
  0x2a   : > { %485 = dma.hbm_to_vmem [thread:$0]  (!%p809_p10), %s212_s23, 64, %s214_s27, %s202_s2  }
  0x2b   : > { %s230_s12 = sshll.u32 %s228_s8, 4  ;;  %s224_s13 = scalar_lea.vmem [#allocation6], %s455_s14  ;;  %s231_s12 = int_to_ptr.hbm [resolvable:$true] %s230_s12 }
  0x2c   : > { %s232_s20 = sshll.u32 %s224_s13, 4  ;;  %s221_s7 = scalar_lea.sflag [#allocation7], %s220_s9  ;;  %s233_s20 = int_to_ptr.vmem [resolvable:$true] %s232_s20 }
  0x2d   : > { %s594_s17 = sshra.s32 %s231_s12, 4  ;;  %s601_s16 = scalar_lea.hbm %s902_s1, 8  ;;  %s595_s17 = int_to_ptr.hbm [resolvable:$true] %s594_s17 }
  0x2e   : > { %s596_s26 = scalar_lea.hbm %s595_s17, 4  ;;  %p602_p9 = scmp.lt.s32.totalorder %s595_s17, %s902_s1 }
  0x2f   : > { %p597_p2 = scmp.ne.s32.totalorder %s595_s17, %s596_s26  ;;  %p603_p13 = scmp.lt.s32.totalorder %s601_s16, %s596_s26 }
  0x31   : > { %p599_p12 = pnand %p597_p2, %p568_p11  ;;  %p604_p3 = por %p603_p13, %p602_p9 }
  0x33   : > { %p600_p0 = pneg %p599_p12 }
  0x35   : > { %p605_p5 = pnand %p604_p3, %p600_p0 }
  0x37   : > { %608 = shalt.err (!%p605_p5)
}
  0x38   : > { %488 = dma.hbm_to_vmem [thread:$0]  (!%p809_p10), %s231_s12, 64, %s233_s20, %s221_s7  }
  0x39   : > { %241 = sbr.rel (%p774_p8) target bundleno = 349 (0x15d), region = 40  ;;  %s844_s14 = sand.u32 (!%p774_p8), 1, %s690_s19  }
  0x3a   : > { %s460_s23 = sshll.u32 (!%p774_p8), %s844_s14, 2  ;;  %s244_s27 = scalar_lea.sflag (!%p774_p8), [#allocation4], %s844_s14 }
  0x3b   : > { %s247_s8 = scalar_lea.vmem (!%p774_p8), [#allocation3], %s460_s23 }
  0x3e   : > { %669 = dma.done.wait (%p761_p4), %s244_s27, 64  }
  0x3f   : > { %671 = vsyncadd (%p761_p4), %s244_s27, 4294967232  ;;  %s253_s20 = sand.u32 1, %s752_s22   ;;  %s257_s29 = scalar_lea.vmem [#allocation6], %s460_s23 }
  0x40   : > { %s254_s7 = scalar_lea.sflag [#allocation7], %s253_s20 }
  0x41   : > { %673 = dma.done.wait (%p761_p4), %s254_s7, 64  }
  0x42   : > { %675 = vsyncadd (%p761_p4), %s254_s7, 4294967232 }
  0x43   : > { %677 = dma.done.wait (%p45_p1), [#allocation7], 128  }
  0x44   : > { %679 = vsyncadd (%p45_p1), [#allocation7], 4294967168  ;;  %v295_v0 = vld [vmem:[%s247_s8] sm:$0xf]  ;;  %v297_v1 = vld [vmem:[%s257_s29] sm:$0xf] }
  0x45   : > { %296 = vst [vmem:[#allocation2] sm:$0xf] %v295_v0  ;;  %v300_v2 = vld [vmem:[#allocation8] sm:$0xff]  ;;  %s463_s24 = sshll.u32 %s844_s14, 3  ;;  %s465_s28 = sshll.u32 %s752_s22, 3 }
  0x46   : > { %298 = vst [vmem:[#allocation2 + $0x4] sm:$0xf] %v297_v1  ;;  %v530_v18 = vld [vmem:[%s904_s3] ss:$0 sm:$0xff]  ;;  %s344_s17 = scalar_lea.hbm %s906_s5, %s465_s28  ;;  %s294_s22 = scalar_lea.vmem [#allocation9], %s463_s24 }
  0x47   : > { %v531_v21 = vld [vmem:[%s905_s4] ss:$0 sm:$0xff]  ;;  %s346_s15 = sshll.u32 %s294_s22, 4  ;;  %s348_s16 = sshll.u32 %s344_s17, 4  ;;  %s347_s15 = int_to_ptr.vmem [resolvable:$true] %s346_s15  ;;  %s349_s16 = int_to_ptr.hbm [resolvable:$true] %s348_s16 }
  0x48   : > { %s334_s30 = scalar_lea.sflag [#allocation5], %s844_s14  ;;  %s638_s2 = sshra.s32 %s349_s16, 4  ;;  %s639_s2 = int_to_ptr.hbm [resolvable:$true] %s638_s2 }
  0x49   : > { %s640_s23 = scalar_lea.hbm %s639_s2, 8  ;;  %s644_s20 = scalar_lea.hbm %s906_s5, 16 }
  0x4a   : > { %p641_p1 = scmp.ne.s32.totalorder %s639_s2, %s640_s23  ;;  %p645_p10 = scmp.lt.s32.totalorder %s639_s2, %s906_s5 }
  0x4b   : > { %p646_p11 = scmp.lt.s32.totalorder %s644_s20, %s640_s23 }
  0x4c   : > { %p642_p4 = pnand %p641_p1, %p798_p7 }
  0x4d   : > { %v299_v3 = vld [vmem:[#allocation2] sm:$0xff]  ;;  %p647_p2 = por %p646_p11, %p645_p10 }
  0x4e   : > { %v301_v4 = vadd.f32 %v300_v2, %v299_v3  ;;  %p643_p8 = pneg %p642_p4 }
  0x50   : > { %302 = vadd.xlane.f32.xlu0 %v301_v4  ;;  %p648_p12 = pnand %p647_p2, %p643_p8 }
  0xc3   : > { %v303_v5 = vpop.xlane.xlu0 %302 }
  0xc4   : > { %v304_v6 = vmul.f32 0.0078125, %v303_v5 }
  0xc6   : > { %v305_v7 = vsub.f32 %v301_v4, %v304_v6 }
  0xc8   : > { %v306_v8 = vmul.f32 %v305_v7, %v305_v7 }
  0xca   : > { %307 = vadd.xlane.f32.xlu0 %v306_v8 }
 0x13d   : > { %v308_v9 = vpop.xlane.xlu0 %307 }
 0x13e   : > { %v309_v10 = vmul.f32 0.0078125, %v308_v9 }
 0x140   : > { %v310_v11 = vadd.f32 1e-05, %v309_v10 }
 0x142   : > { %532 = vrsqrt.f32 %v310_v11  ;;  %vm317_vm1 = vweird.f32 %v310_v11 }
 0x148   : > { %v533_v12 = vpop.eup %532 }
 0x149   : > { %v312_v13 = vmul.f32 %v533_v12, %v310_v11  ;;  %vm318_vm0 = vweird.f32 %v533_v12 }
 0x14a   : > { %vm319_vm2 = vmor %vm317_vm1, %vm318_vm0 }
 0x14b   : > { %v313_v14 = vmul.f32 %v533_v12, %v312_v13 }
 0x14d   : > { %v314_v15 = vmul.f32 0.5, %v313_v14 }
 0x14f   : > { %v315_v16 = vsub.f32 1.5, %v314_v15 }
 0x151   : > { %v316_v17 = vmul.f32 %v533_v12, %v315_v16 }
 0x153   : > { %v320_v19 = vsel %vm319_vm2, %v533_v12, %v316_v17 }
 0x154   : > { %v321_v20 = vmul.f32 %v320_v19, %v305_v7 }
 0x156   : > { %v327_v22 = vmul.f32 %v530_v18, %v321_v20 }
 0x158   : > { %v331_v23 = vadd.f32 %v531_v21, %v327_v22 }
 0x15a   : > { %332 = vst [vmem:[%s294_s22] sm:$0xff] %v331_v23 }
 0x15b   : > { %651 = shalt.err (!%p648_p12)
}
 0x15c   : > { %476 = dma.vmem_to_hbm [thread:$0]  (%p798_p7), %s347_s15, 128, %s349_s16, %s334_s30  }
 0x15d PF: > { %s360_s14 = sand.u32 1, %s686_s18   ;;  %p920_p0 = scmp.ge.s32.totalorder %s698_s21, 2 }
 0x15e   : > { %s361_s24 = scalar_lea.sflag [#allocation5], %s360_s14 }
 0x15f   : > { %p490_p9 = pnand %p920_p0, %p766_p6 }
 0x161   : > { %p491_p13 = pneg %p490_p9 }
 0x163   : > { %681 = dma.done.wait (%p491_p13), %s361_s24, 128  }
 0x164   : > { %683 = vsyncadd (%p491_p13), %s361_s24, 4294967168  ;;  %s921_s21 = sld [smem:[#allocation15_spill]]  ;;  %s924_s18 = smov %s690_s19 }
 0x165   : > { %s922_s28 = sld [smem:[#allocation14_spill]] }
 0x166   : > { %s923_s20 = sld [smem:[#allocation16_spill]] }
 0x16a   : > { %p21_p3 = scmp.ge.s32.totalorder %s921_s21, 4  }
 0x16b   : > { %s925_s19 = smov %s922_s28 }
 0x16c   :  { %23 = sbr.rel (!%p21_p3) target bundleno = 9 (0x9), region = 102 }
 0x171   :  { %367 = vsyncpa [#allocation4], 1 }
 0x172   :  { %369 = vsyncpa [#allocation4 + $0x1], 1 }
 0x173   :  { %370 = vsyncpa [#allocation7], 1 }
 0x174   :  { %372 = vsyncpa [#allocation7 + $0x1], 1 }
 0x175   :  { %373 = vsyncpa [#allocation5], 1 }
 0x176   :  { %375 = vsyncpa [#allocation5 + $0x1], 1 }

</bundles_post_ra>
